<compile_context>
chip_gen: v6e
topology: v6e:2x2x1
jax: 0.10.0
libtpu: 0.0.40
codegen_flags: <defaults>
</compile_context>

<pallas_src>
import functools

import jax
import jax.numpy as jnp
from jax import lax
from jax.experimental import pallas as pl
from jax.experimental.pallas import tpu as pltpu


def _round_up(x, m):
    return -(-x // m) * m


# ----------------------------------------------------------------------------
# Hoisted input->hidden gates:  (M, K) @ (K, 4H) + bias, tiled over M.
# ----------------------------------------------------------------------------
def _gates_x_kernel(x_ref, w_ref, b_ref, o_ref):
    o_ref[...] = (
        jnp.dot(x_ref[...], w_ref[...], preferred_element_type=jnp.float32)
        + b_ref[...]
    ).astype(o_ref.dtype)


def _gates_x_matmul(x2d, w_ih_t, bias, tile_m=512):
    m, k = x2d.shape
    n = w_ih_t.shape[1]
    tm = min(tile_m, _round_up(m, 8))
    m_pad = _round_up(m, tm)
    if m_pad != m:
        x2d = jnp.pad(x2d, ((0, m_pad - m), (0, 0)))
    out = pl.pallas_call(
        _gates_x_kernel,
        out_shape=jax.ShapeDtypeStruct((m_pad, n), jnp.float32),
        grid_spec=pltpu.PrefetchScalarGridSpec(
            num_scalar_prefetch=0,
            grid=(m_pad // tm,),
            in_specs=[
                pl.BlockSpec((tm, k), lambda i: (i, 0)),
                pl.BlockSpec((k, n), lambda i: (0, 0)),
                pl.BlockSpec((1, n), lambda i: (0, 0)),
            ],
            out_specs=pl.BlockSpec((tm, n), lambda i: (i, 0)),
        ),
        compiler_params=pltpu.CompilerParams(
            dimension_semantics=("parallel",),
        ),
    )(x2d, w_ih_t, bias.reshape(1, n).astype(jnp.float32))
    return out[:m]


# ----------------------------------------------------------------------------
# Fused multi-layer LSTM recurrence (+ K=1 projection epilogue).
# ----------------------------------------------------------------------------
def _lstm_cell(gates, c_prev, hidden):
    i_g = jax.nn.sigmoid(gates[:, 0 * hidden:1 * hidden])
    f_g = jax.nn.sigmoid(gates[:, 1 * hidden:2 * hidden])
    g_g = jnp.tanh(gates[:, 2 * hidden:3 * hidden])
    o_g = jax.nn.sigmoid(gates[:, 3 * hidden:4 * hidden])
    c_new = f_g * c_prev + i_g * g_g
    h_new = o_g * jnp.tanh(c_new)
    return h_new, c_new


def _fused_lstm_kernel(gx0_ref, whh_ref, wih_ref, b_ref, pw_ref, pb_ref,
                       out_ref, logit_ref,
                       h_sc, c_sc, act_sc, gx_sc,
                       *, num_layers, tb, hidden):
    blk = pl.program_id(0)

    @pl.when(blk == 0)
    def _init():
        h_sc[...] = jnp.zeros_like(h_sc)
        c_sc[...] = jnp.zeros_like(c_sc)

    bp = act_sc.shape[1]

    def run_layer(layer, gates_ref):
        # gates_ref[t] = precomputed x_t @ W_ih^T + (b_ih + b_hh) for this layer.
        whh = whh_ref[layer]                                  # (H, 4H)

        def step(t, carry):
            h_prev, c_prev = carry
            gates = gates_ref[t] + jnp.dot(
                h_prev, whh, preferred_element_type=jnp.float32)
            h_new, c_new = _lstm_cell(gates, c_prev, hidden)
            act_sc[t] = h_new
            return (h_new, c_new)

        h_fin, c_fin = lax.fori_loop(
            0, tb, step, (h_sc[layer], c_sc[layer]), unroll=True)
        h_sc[layer] = h_fin
        c_sc[layer] = c_fin

    # Layer 0: its input->hidden gates were hoisted into the big pre-matmul.
    run_layer(0, gx0_ref)

    # Layers 1..L-1: hoist the input->hidden matmul over the whole time block,
    # keeping the inter-layer activation in VMEM scratch.
    for layer in range(1, num_layers):
        act2d = act_sc[...].reshape(tb * bp, hidden)
        gx = jnp.dot(act2d, wih_ref[layer - 1],
                     preferred_element_type=jnp.float32) + b_ref[layer - 1]
        gx_sc[...] = gx.reshape(tb, bp, 4 * hidden)
        run_layer(layer, gx_sc)

    # Epilogue: lane-dense write of the last layer's hidden slab + fused projection.
    h_all = act_sc[...]                                       # (TB, Bp, H)
    out_ref[...] = h_all.astype(out_ref.dtype)
    pw = pw_ref[...].reshape(1, 1, hidden)
    logits = jnp.sum(h_all * pw, axis=-1, keepdims=True) + pb_ref[...]
    logit_ref[...] = logits.astype(logit_ref.dtype)


def _choose_time_block(seq_len, b_pad, hidden, vmem_budget_bytes=8 << 20):
    # f32 bytes of VMEM residency per timestep:
    #   gates_x0 in (x2 double-buffer) + out (x2) + logits (x2) + gx scratch + act scratch
    per_t = 4 * b_pad * (4 * hidden * 2 + hidden * 2 + 1 * 2 + 4 * hidden + hidden)
    tb = max(1, min(seq_len, 32, vmem_budget_bytes // max(per_t, 1)))
    if tb >= 8:
        tb = (tb // 8) * 8
    return tb


# ----------------------------------------------------------------------------
# Full discriminator forward
# ----------------------------------------------------------------------------
def lstm_discriminator_forward(target, cond, params, time_block=None):
    """target: (B, T, target_dim), cond: (B, T, condition_dim), batch_first.

    Returns (logits (B, T, 1), output (B, T, H)) matching the PyTorch module.
    """
    layers = params["lstm_layers"]
    num_layers = len(layers)
    hidden = layers[0]["w_hh_t"].shape[0]
    batch, seq, _ = target.shape

    x = jnp.concatenate([target, cond], axis=2).astype(jnp.float32)   # (B, T, D0)
    d_in = x.shape[-1]

    # Pad batch to 8-sublane granularity (pad rows are zeros, discarded at the end).
    b_pad = _round_up(batch, 8)
    if b_pad != batch:
        x = jnp.pad(x, ((0, b_pad - batch), (0, 0), (0, 0)))
    x = jnp.transpose(x, (1, 0, 2))                                    # (T, Bp, D0)

    tb = time_block or _choose_time_block(seq, b_pad, hidden)
    t_pad = _round_up(seq, tb)
    if t_pad != seq:
        x = jnp.pad(x, ((0, t_pad - seq), (0, 0), (0, 0)))

    # Hoisted layer-0 input->hidden gates: one big MXU matmul over T*B rows.
    gx0 = _gates_x_matmul(x.reshape(t_pad * b_pad, d_in),
                          layers[0]["w_ih_t"], layers[0]["bias"])
    gx0 = gx0.reshape(t_pad, b_pad, 4 * hidden)

    # Stacked per-layer weights for the fused recurrence kernel.
    whh_all = jnp.stack([lp["w_hh_t"] for lp in layers])               # (L, H, 4H)
    if num_layers > 1:
        wih_rest = jnp.stack([lp["w_ih_t"] for lp in layers[1:]])      # (L-1, H, 4H)
        b_rest = jnp.stack([lp["bias"].reshape(1, 4 * hidden) for lp in layers[1:]])
    else:
        wih_rest = jnp.zeros((1, hidden, 4 * hidden), jnp.float32)
        b_rest = jnp.zeros((1, 1, 4 * hidden), jnp.float32)
    n_rest = wih_rest.shape[0]

    pw = params["proj_w"].reshape(1, hidden).astype(jnp.float32)
    pb = params["proj_b"].reshape(1, 1).astype(jnp.float32)

    kernel = functools.partial(_fused_lstm_kernel, num_layers=num_layers,
                               tb=tb, hidden=hidden)

    out, logits = pl.pallas_call(
        kernel,
        out_shape=(jax.ShapeDtypeStruct((t_pad, b_pad, hidden), jnp.float32),
                   jax.ShapeDtypeStruct((t_pad, b_pad, 1), jnp.float32)),
        grid_spec=pltpu.PrefetchScalarGridSpec(
            num_scalar_prefetch=0,
            grid=(t_pad // tb,),
            in_specs=[
                pl.BlockSpec((tb, b_pad, 4 * hidden), lambda k: (k, 0, 0)),       # gx0
                pl.BlockSpec((num_layers, hidden, 4 * hidden), lambda k: (0, 0, 0)),
                pl.BlockSpec((n_rest, hidden, 4 * hidden), lambda k: (0, 0, 0)),
                pl.BlockSpec((n_rest, 1, 4 * hidden), lambda k: (0, 0, 0)),
                pl.BlockSpec((1, hidden), lambda k: (0, 0)),                      # proj w
                pl.BlockSpec((1, 1), lambda k: (0, 0)),                           # proj b
            ],
            out_specs=(
                pl.BlockSpec((tb, b_pad, hidden), lambda k: (k, 0, 0)),
                pl.BlockSpec((tb, b_pad, 1), lambda k: (k, 0, 0)),
            ),
            scratch_shapes=[
                pltpu.VMEM((num_layers, b_pad, hidden), jnp.float32),   # h state
                pltpu.VMEM((num_layers, b_pad, hidden), jnp.float32),   # c state
                pltpu.VMEM((tb, b_pad, hidden), jnp.float32),           # inter-layer act
                pltpu.VMEM((tb, b_pad, 4 * hidden), jnp.float32),       # gates_x (l >= 1)
            ],
        ),
        compiler_params=pltpu.CompilerParams(
            dimension_semantics=("arbitrary",),
            vmem_limit_bytes=32 * 1024 * 1024,
        ),
    )(gx0, whh_all, wih_rest, b_rest, pw, pb)

    output = jnp.transpose(out[:seq, :batch, :], (1, 0, 2))            # (B, T, H)
    logits = jnp.transpose(logits[:seq, :batch, :], (1, 0, 2))         # (B, T, 1)
    return logits, output


# ----------------------------------------------------------------------------
# Deterministic parameter init (matches shapes of nn.LSTM / nn.Linear)
# ----------------------------------------------------------------------------
def init_params(key, target_dim, condition_dim, hidden_dim, num_layers):
    d0 = target_dim + condition_dim
    params = {"lstm_layers": []}
    scale = 1.0 / jnp.sqrt(hidden_dim)
    for layer in range(num_layers):
        d_in = d0 if layer == 0 else hidden_dim
        key, k1, k2, k3, k4 = jax.random.split(key, 5)
        w_ih = jax.random.uniform(k1, (4 * hidden_dim, d_in), jnp.float32, -scale, scale)
        w_hh = jax.random.uniform(k2, (4 * hidden_dim, hidden_dim), jnp.float32, -scale, scale)
        b_ih = jax.random.uniform(k3, (4 * hidden_dim,), jnp.float32, -scale, scale)
        b_hh = jax.random.uniform(k4, (4 * hidden_dim,), jnp.float32, -scale, scale)
        params["lstm_layers"].append({
            "w_ih_t": w_ih.T,              # (d_in, 4H)  pre-transposed for x @ W^T
            "w_hh_t": w_hh.T,              # (H, 4H)
            "bias": b_ih + b_hh,           # (4H,)
        })
    key, k5, k6 = jax.random.split(key, 3)
    params["proj_w"] = jax.random.uniform(k5, (hidden_dim, 1), jnp.float32, -scale, scale)
    params["proj_b"] = jax.random.uniform(k6, (1,), jnp.float32, -scale, scale)
    return params


# ----------------------------------------------------------------------------
# Pure-JAX reference (lax.scan) for correctness check
# ----------------------------------------------------------------------------
def reference_forward(target, cond, params):
    x = jnp.concatenate([target, cond], axis=2)            # (B, T, D0)
    x = jnp.transpose(x, (1, 0, 2))                        # (T, B, D0)
    h_dim = params["lstm_layers"][0]["w_hh_t"].shape[0]
    b = x.shape[1]

    for lp in params["lstm_layers"]:
        def step(carry, x_t, lp=lp):
            h, c = carry
            gates = x_t @ lp["w_ih_t"] + h @ lp["w_hh_t"] + lp["bias"]
            i = jax.nn.sigmoid(gates[:, 0 * h_dim:1 * h_dim])
            f = jax.nn.sigmoid(gates[:, 1 * h_dim:2 * h_dim])
            g = jnp.tanh(gates[:, 2 * h_dim:3 * h_dim])
            o = jax.nn.sigmoid(gates[:, 3 * h_dim:4 * h_dim])
            c = f * c + i * g
            h = o * jnp.tanh(c)
            return (h, c), h

        init = (jnp.zeros((b, h_dim), jnp.float32), jnp.zeros((b, h_dim), jnp.float32))
        _, x = lax.scan(step, init, x)

    output = jnp.transpose(x, (1, 0, 2))
    logits = output @ params["proj_w"] + params["proj_b"]
    return logits, output


if __name__ == "__main__":
    TARGET_DIM = 4
    CONDITION_DIM = 4
    HIDDEN_DIM = 32
    NUM_LAYERS = 2
    BATCH = 2
    SEQ = 8

    key = jax.random.PRNGKey(0)
    kp, kt, kc = jax.random.split(key, 3)

    params = init_params(kp, TARGET_DIM, CONDITION_DIM, HIDDEN_DIM, NUM_LAYERS)
    target = jax.random.normal(kt, (BATCH, SEQ, TARGET_DIM), jnp.float32)
    cond = jax.random.normal(kc, (BATCH, SEQ, CONDITION_DIM), jnp.float32)

    logits, output = lstm_discriminator_forward(target, cond, params)
    logits, output = jax.block_until_ready((logits, output))

    ref_logits, ref_output = reference_forward(target, cond, params)

    assert logits.shape == (BATCH, SEQ, 1)
    assert output.shape == (BATCH, SEQ, HIDDEN_DIM)
    assert jnp.allclose(logits, ref_logits, rtol=1e-4, atol=1e-5)
    assert jnp.allclose(output, ref_output, rtol=1e-4, atol=1e-5)

    print("KERNEL_OK")
</pallas_src>

<mosaic_0001>
module attributes {stable_mosaic.version = 11 : i64} {
  func.func @_gates_x_kernel(%arg0: i32, %arg1: memref<64x8xf32, #tpu.memory_space<vmem>>, %arg2: memref<8x128xf32, #tpu.memory_space<vmem>>, %arg3: memref<1x128xf32, #tpu.memory_space<vmem>>, %arg4: memref<64x128xf32, #tpu.memory_space<vmem>>) attributes {dimension_semantics = [#tpu.dimension_semantics<parallel>], iteration_bounds = array<i64: 1>, scalar_prefetch = 0 : i64, scratch_operands = 0 : i64, tpu.core_type = #tpu.core_type<tc>, window_params = [{transform_indices = @transform_0, window_bounds = array<i64: 64, 8>}, {pipeline_mode = #tpu.pipeline_mode<synchronous>, transform_indices = @transform_1, window_bounds = array<i64: 8, 128>}, {pipeline_mode = #tpu.pipeline_mode<synchronous>, transform_indices = @transform_2, window_bounds = array<i64: 1, 128>}, {transform_indices = @transform_3, window_bounds = array<i64: 64, 128>}]} {
    %c0 = arith.constant 0 : index
    %c0_0 = arith.constant 0 : index
    %0 = vector.load %arg1[%c0, %c0_0] : memref<64x8xf32, #tpu.memory_space<vmem>>, vector<64x8xf32>
    %c0_1 = arith.constant 0 : index
    %c0_2 = arith.constant 0 : index
    %1 = vector.load %arg2[%c0_1, %c0_2] : memref<8x128xf32, #tpu.memory_space<vmem>>, vector<8x128xf32>
    %cst = arith.constant dense<0.000000e+00> : vector<64x128xf32>
    %2 = tpu.matmul %0, %1, %cst {dimension_numbers = #tpu.dot_dimension_numbers<[1], [0], [0], [1], [0, 0, 1, 1], [], []>} : vector<64x8xf32>, vector<8x128xf32>, vector<64x128xf32> -> vector<64x128xf32>
    %c0_3 = arith.constant 0 : index
    %c0_4 = arith.constant 0 : index
    %3 = vector.load %arg3[%c0_3, %c0_4] : memref<1x128xf32, #tpu.memory_space<vmem>>, vector<1x128xf32>
    %4 = vector.broadcast %3 : vector<1x128xf32> to vector<64x128xf32>
    %5 = arith.addf %2, %4 : vector<64x128xf32>
    %c0_5 = arith.constant 0 : index
    %c0_6 = arith.constant 0 : index
    %6 = vector.load %arg4[%c0_5, %c0_6] : memref<64x128xf32, #tpu.memory_space<vmem>>, vector<64x128xf32>
    tpu.vector_store %arg4[%c0_5, %c0_6], %5 {strides = array<i32>} : memref<64x128xf32, #tpu.memory_space<vmem>>, vector<64x128xf32>,
    return
  }
  func.func @transform_0(%arg0: i32) -> (i32, i32) {
    %c0_i32 = arith.constant 0 : i32
    %c0_i32_0 = arith.constant 0 : i32
    return %arg0, %c0_i32 : i32, i32
  }
  func.func @transform_1(%arg0: i32) -> (i32, i32) {
    %c0_i32 = arith.constant 0 : i32
    %c0_i32_0 = arith.constant 0 : i32
    %c0_i32_1 = arith.constant 0 : i32
    return %c0_i32, %c0_i32_0 : i32, i32
  }
  func.func @transform_2(%arg0: i32) -> (i32, i32) {
    %c0_i32 = arith.constant 0 : i32
    %c0_i32_0 = arith.constant 0 : i32
    %c0_i32_1 = arith.constant 0 : i32
    return %c0_i32, %c0_i32_0 : i32, i32
  }
  func.func @transform_3(%arg0: i32) -> (i32, i32) {
    %c0_i32 = arith.constant 0 : i32
    %c0_i32_0 = arith.constant 0 : i32
    return %arg0, %c0_i32 : i32, i32
  }
}

</mosaic_0001>

<bundles_post_ra>
// kernel: tpu_custom_call.1
= control target key start
LH: loop header
LB: loop body
LE: loop exit
PB: predicated region body
PF: predicated region fallthrough
CT: control target
= control target key end

     0   :  { %vm31_vm0 = vcmask 64512   ;;  %s308_s0 = inlined_call_operand.vmem [shape: f32[64,8], index: 0, kind: input, shape index: {}]   ;;  %s309_s1 = inlined_call_operand.vmem [shape: f32[8,128], index: 1, kind: input, shape index: {}]   ;;  %s310_s2 = inlined_call_operand.vmem [shape: f32[1,128], index: 2, kind: input, shape index: {}]   ;;  %s311_s3 = inlined_call_operand.hbm [shape: f32[64,128], index: 3, kind: output, shape index: {}]  }
   0x1   :  { %v23_v0 = vld [vmem:[%s309_s1] sm:$0xff]  ;;  %v16_v3 = vld [vmem:[%s308_s0 + $0x8] sm:$0xff]  ;;  %v17_v5 = vld [vmem:[%s308_s0 + $0x10] sm:$0xff] }
   0x2   :  { %v15_v1 = vld [vmem:[%s308_s0] sm:$0xff]  ;;  %203 = vmatprep.subr.mxu0 %v23_v0  ;;  %217 = vmatprep.subr.mxu1 %v23_v0  ;;  %v20_v4 = vld [vmem:[%s308_s0 + $0x28] sm:$0xff]  ;;  %v21_v6 = vld [vmem:[%s308_s0 + $0x30] sm:$0xff] }
   0x3   :  { %v19_v2 = vld [vmem:[%s308_s0 + $0x20] sm:$0xff]  ;;  %204 = vmatpush3.msra.mxu0 %v23_v0  ;;  %218 = vmatpush3.msra.mxu1 %v23_v0 }
   0x4   :  { %205 = vmatprep.mubr.msk.f32.mxu0 %vm31_vm0, %v15_v1  ;;  %211 = vmatprep.mubr.msk.f32.mxu1 %vm31_vm0, %v19_v2 }
   0x5   :  { %8 = vsyncpa [#allocation3], 0  ;;  %206 = vmatmul.mubr.msk.f32.vlgmr.msra.gmra.mxu0 %vm31_vm0, %v16_v3  ;;  %212 = vmatmul.mubr.msk.f32.vlgmr.msra.gmra.mxu1 %vm31_vm0, %v20_v4  ;;  %v18_v7 = vld [vmem:[%s308_s0 + $0x18] sm:$0xff]  ;;  %v185_v9 = vld [vmem:[%s310_s2] ss:$0 sm:$0xff]  ;;  %s244_s4 = smov [#allocation2]  }
   0x6   :  { %208 = vmatprep.mubr.msk.f32.mxu0 %vm31_vm0, %v17_v5  ;;  %214 = vmatprep.mubr.msk.f32.mxu1 %vm31_vm0, %v21_v6  ;;  %v22_v8 = vld [vmem:[%s308_s0 + $0x38] sm:$0xff]  ;;  %s174_s0 = sshll.u32 %s244_s4, 4  ;;  %s175_s0 = int_to_ptr.vmem [resolvable:$true] %s174_s0 }
   0x7   :  { %s222_s2 = scalar_lea.vmem %s175_s0, 1024  ;;  %p227_p1 = scmp.lt.s32.totalorder %s175_s0, %s175_s0 }
   0x8   :  { %p223_p0 = scmp.ne.s32.totalorder %s175_s0, %s222_s2  ;;  %p228_p2 = scmp.lt.s32.totalorder %s222_s2, %s222_s2 }
   0x9   :  { %209 = vmatmul.mubr.msk.f32.gmra.mxu0 %vm31_vm0, %v18_v7  ;;  %215 = vmatmul.mubr.msk.f32.gmra.mxu1 %vm31_vm0, %v22_v8 }
   0xa   :  { %p229_p3 = por %p228_p2, %p227_p1 }
   0xc   :  { %p230_p4 = pnand %p229_p3, %p223_p0 }
  0xc5   :  { %v207_v10 = vpop.f32.mrf.mxu0  ;;  %v213_v11 = vpop.f32.mrf.mxu1 }
  0xc6   :  { %v128_v12 = vadd.f32 %v207_v10, %v185_v9  ;;  %v148_v13 = vadd.f32 %v213_v11, %v185_v9 }
  0xc7   :  { %v122_v14 = vpop.f32.mrf.mxu0  ;;  %v142_v15 = vpop.f32.mrf.mxu1 }
  0xc8   :  { %162 = vst [vmem:[#allocation2 + $0x8] sm:$0xff] %v128_v12  ;;  %166 = vst [vmem:[#allocation2 + $0x28] sm:$0xff] %v148_v13  ;;  %v123_v16 = vadd.f32 %v185_v9, %v122_v14  ;;  %v143_v17 = vadd.f32 %v185_v9, %v142_v15 }
  0xc9   :  { %v210_v18 = vpop.f32.mrf.mxu0  ;;  %v216_v19 = vpop.f32.mrf.mxu1 }
  0xca   :  { %161 = vst [vmem:[#allocation2] sm:$0xff] %v123_v16  ;;  %165 = vst [vmem:[#allocation2 + $0x20] sm:$0xff] %v143_v17  ;;  %v138_v20 = vadd.f32 %v210_v18, %v185_v9  ;;  %v158_v21 = vadd.f32 %v216_v19, %v185_v9 }
  0xcb   :  { %v132_v22 = vpop.f32.mrf.mxu0  ;;  %v152_v23 = vpop.f32.mrf.mxu1 }
  0xcc   :  { %164 = vst [vmem:[#allocation2 + $0x18] sm:$0xff] %v138_v20  ;;  %168 = vst [vmem:[#allocation2 + $0x38] sm:$0xff] %v158_v21  ;;  %v133_v24 = vadd.f32 %v185_v9, %v132_v22  ;;  %v153_v25 = vadd.f32 %v185_v9, %v152_v23 }
  0xce   :  { %163 = vst [vmem:[#allocation2 + $0x10] sm:$0xff] %v133_v24  ;;  %167 = vst [vmem:[#allocation2 + $0x30] sm:$0xff] %v153_v25 }
  0xcf   :  { %233 = shalt.err (!%p230_p4)
}
  0xd0   :  { %s245_s5 = smov 128   ;;  %s246_s6 = smov 8  }
  0xd1   :  { %180 = dma.vmem_to_hbm [thread:$0]  %s175_s0, 1024, %s311_s3, [#allocation3], %s245_s5, %s245_s5, %s246_s6  }
  0xd2   :  { %242 = dma.done.wait [#allocation3], 1024  }
  0xd3   :  { %243 = vsyncadd [#allocation3], 4294966272 }
  0xd4   :  { %184 = vsyncpa [#allocation3], 1 }

</bundles_post_ra>
